<compile_context>
chip_gen: v5e
topology: v5e:2x2
jax: 0.10.0
libtpu: 0.0.40
codegen_flags: <defaults>
</compile_context>

<pallas_src>
import functools

import jax
import jax.numpy as jnp
from jax.experimental import pallas as pl
from jax.experimental.pallas import tpu as pltpu


def _round_up(x, m):
    return ((x + m - 1) // m) * m


def _default_compute_dtype():
    """bf16 MXU operands on bf16-native chips (v6e/v7x), f32 elsewhere."""
    try:
        kind = jax.devices()[0].device_kind.lower()
    except Exception:
        return jnp.float32
    return jnp.bfloat16 if ("v6" in kind or "v7" in kind) else jnp.float32


def critic_kernel(s_ref, a_ref, w1_ref, b1_ref, w2_ref, b2_ref, w3_ref, b3_ref,
                  o_ref, x_ref):
    """Whole-network forward on one batch tile (feature-major, weights resident).

    s_ref: [S, tb], a_ref: [A, tb]                     (compute dtype)
    w1_ref: [H, S+A], w2_ref: [H, H], w3_ref: [1, H]   (compute dtype, torch [out, in])
    b1_ref/b2_ref: [H, 1] f32; b3_ref: (1, 1) f32 scalar in SMEM
    o_ref: [1, tb] f32 (lane-dense);  x_ref: [S+A, tb] VMEM scratch
    """
    S = s_ref.shape[0]
    dt = w2_ref.dtype  # MXU operand dtype (f32 or bf16); accumulation stays f32.

    # Fuse torch.cat into the kernel: pack state/action into one [S+A, tb] tile
    # so layer 1 is a single MXU dot (no duplicated small-K pushes, no host concat).
    x_ref[:S, :] = s_ref[...]
    x_ref[S:, :] = a_ref[...]

    # Layer 1: ReLU(W1 @ x + b1) -> [H, tb]
    h1 = jnp.dot(w1_ref[...], x_ref[...], preferred_element_type=jnp.float32)
    h1 = jnp.maximum(h1 + b1_ref[...], 0.0).astype(dt)

    # Layer 2: ReLU(W2 @ h1 + b2) -> [H, tb]
    h2 = jnp.dot(w2_ref[...], h1, preferred_element_type=jnp.float32)
    h2 = jnp.maximum(h2 + b2_ref[...], 0.0).astype(dt)

    # Layer 3: W3 @ h2 + b3 -> [1, tb]  (lane-dense output store)
    q = jnp.dot(w3_ref[...], h2, preferred_element_type=jnp.float32) + b3_ref[0, 0]
    o_ref[...] = q.astype(o_ref.dtype)


@functools.partial(jax.jit, static_argnames=("tile_b", "compute_dtype"))
def critic_forward(state, action, params, *, tile_b=8192, compute_dtype=None):
    """Critic forward. state: [B, S], action: [B, A] -> q: [B, 1] (float32).

    tile_b: batch tile (lane) size; rounded to a multiple of 128.
    compute_dtype: MXU operand dtype. None = auto (bf16 on v6e/v7x, f32 else).
      Accumulation is always f32.  Note: with bf16, raw state/action lose
      mantissa bits before layer 1 (acceptable for RL observations).
    """
    w1, b1, w2, b2, w3, b3 = params
    B, S = state.shape
    A = action.shape[1]
    H = w1.shape[0]

    cdt = _default_compute_dtype() if compute_dtype is None else compute_dtype
    itemsize = jnp.dtype(cdt).itemsize
    sub = 16 if itemsize == 2 else 8            # native sublane tile (bf16 packs 2x)

    # Feature-major reorientation ("batch on lanes"): one-off wrapper transposes;
    # the [1, B] kernel output reshapes back to [B, 1] for free (same flat layout).
    s_t = state.T.astype(cdt)                   # [S, B]
    a_t = action.T.astype(cdt)                  # [A, B]
    w1c = w1.astype(cdt)                        # [H, S+A]  torch-native [out, in]
    w2c = w2.astype(cdt)                        # [H, H]
    w3c = w3.astype(cdt)                        # [1, H]
    b1c = b1.astype(jnp.float32)                # [H, 1]
    b2c = b2.astype(jnp.float32)                # [H, 1]
    b3c = b3.astype(jnp.float32).reshape(1, 1)  # scalar, lives in SMEM

    # ---- Tile sizing with PADDED (real) VMEM footprints --------------------
    # Per-sample (per-lane) bytes of one grid step: streamed inputs and the f32
    # output are double-buffered by the pipeline; the x scratch plus a few
    # [H, tb] f32 temporaries (h1/h2/relu/cast) are single copies.
    per_lane = (2 * (_round_up(S, sub) + _round_up(A, sub)) * itemsize   # s + a
                + 2 * 8 * 4                                              # out [1,tb] f32
                + _round_up(S + A, sub) * itemsize                       # x scratch
                + 4 * _round_up(H, 8) * 4)                               # f32 temporaries
    vmem_budget = 24 << 20        # stay inside v7x's 32 MiB scoped-VMEM default
    tb_cap = max(128, (vmem_budget // per_lane) // 128 * 128)

    tile_b = max(128, _round_up(int(tile_b), 128))
    if B <= 256:
        tb = B                    # single full-extent block (always a legal shape)
    else:
        # >= 2 grid steps so the "parallel" axis can shard across v7x's 2 TCs.
        two_way = _round_up(pl.cdiv(B, 2), 128)
        tb = max(128, min(tile_b, two_way, tb_cap))
    grid = (pl.cdiv(B, tb),)
    # NOTE: when B % tb != 0, the last block's out-of-range lanes carry padding
    # through the dots; samples are independent per lane and those lanes are
    # never written back, so results are unaffected.

    # Resident weight/bias blocks (x2: Pallas double-buffers even constant maps).
    w_bytes = (_round_up(H, sub) * _round_up(S + A, 128) * itemsize      # W1
               + _round_up(H, sub) * _round_up(H, 128) * itemsize        # W2
               + _round_up(1, sub) * _round_up(H, 128) * itemsize        # W3
               + 2 * _round_up(H, 8) * 128 * 4)                          # b1, b2
    vmem_limit = int(per_lane * tb + 2 * w_bytes + (6 << 20))

    flops = 2 * B * ((S + A) * H + H * H + H)
    bytes_accessed = int(B * (S + A) * itemsize + B * 4
                         + (H * (S + A) + H * H + H) * itemsize + (2 * H + 1) * 4)

    in_specs = [
        pl.BlockSpec((S, tb), lambda i: (0, i)),            # state^T tile (streamed)
        pl.BlockSpec((A, tb), lambda i: (0, i)),            # action^T tile (streamed)
        pl.BlockSpec((H, S + A), lambda i: (0, 0)),         # W1 (VMEM-resident)
        pl.BlockSpec((H, 1), lambda i: (0, 0)),             # b1
        pl.BlockSpec((H, H), lambda i: (0, 0)),             # W2
        pl.BlockSpec((H, 1), lambda i: (0, 0)),             # b2
        pl.BlockSpec((1, H), lambda i: (0, 0)),             # W3
        pl.BlockSpec(memory_space=pltpu.MemorySpace.SMEM),  # b3 scalar
    ]
    out_specs = pl.BlockSpec((1, tb), lambda i: (0, i))     # lane-dense output

    q_t = pl.pallas_call(
        critic_kernel,
        out_shape=jax.ShapeDtypeStruct((1, B), jnp.float32),
        grid=grid,
        in_specs=in_specs,
        out_specs=out_specs,
        scratch_shapes=[pltpu.VMEM((S + A, tb), cdt)],
        compiler_params=pltpu.CompilerParams(
            dimension_semantics=("parallel",),
            vmem_limit_bytes=vmem_limit,
        ),
        cost_estimate=pl.CostEstimate(flops=flops, transcendentals=0,
                                      bytes_accessed=bytes_accessed),
    )(s_t, a_t, w1c, b1c, w2c, b2c, w3c, b3c)

    return q_t.reshape(B, 1)


def init_params(key, state_dim, action_dim, hidden=32):
    """nn.Linear-style init, U(-1/sqrt(fan_in), 1/sqrt(fan_in)).

    Weights are PyTorch-native [out_features, in_features]; biases are stored as
    [out_features, 1] columns (b3 is a (1, 1) scalar) to match the feature-major
    kernel layout.
    """
    dims = [(state_dim + action_dim, hidden), (hidden, hidden), (hidden, 1)]
    raw = []
    for i, (fan_in, fan_out) in enumerate(dims):
        kw, kb = jax.random.split(jax.random.fold_in(key, i))
        bound = fan_in ** -0.5
        w = jax.random.uniform(kw, (fan_out, fan_in), jnp.float32, -bound, bound)
        b = jax.random.uniform(kb, (fan_out, 1), jnp.float32, -bound, bound)
        raw.extend([w, b])
    return tuple(raw)   # (w1, b1, w2, b2, w3, b3)


def critic_reference(state, action, params):
    """Pure-JAX f32 reference matching the PyTorch module."""
    w1, b1, w2, b2, w3, b3 = params
    x = jnp.concatenate([state, action], axis=1).astype(jnp.float32)
    h1 = jnp.maximum(x @ w1.T + b1[:, 0], 0.0)
    h2 = jnp.maximum(h1 @ w2.T + b2[:, 0], 0.0)
    return h2 @ w3.T + b3[:, 0]


if __name__ == "__main__":
    key = jax.random.PRNGKey(0)
    batch, state_dim, action_dim = 64, 6, 2

    k_s, k_a, k_p, k_s2, k_a2 = jax.random.split(key, 5)
    state = jax.random.normal(k_s, (batch, state_dim), jnp.float32)
    action = jax.random.normal(k_a, (batch, action_dim), jnp.float32)
    params = init_params(k_p, state_dim, action_dim)

    q_ref = critic_reference(state, action, params)

    # 1) f32, single-tile path (B <= 256 -> one full-extent block).
    q = jax.block_until_ready(
        critic_forward(state, action, params, compute_dtype=jnp.float32))
    assert q.shape == (batch, 1), q.shape
    assert jnp.allclose(q, q_ref, atol=1e-4, rtol=1e-4)

    # 2) f32, gridded path with a ragged last tile: 400 rows, 128-lane tiles
    #    -> 4 grid steps, last step has 16 valid lanes (tests OOB-lane padding).
    big_b = 400
    state2 = jax.random.normal(k_s2, (big_b, state_dim), jnp.float32)
    action2 = jax.random.normal(k_a2, (big_b, action_dim), jnp.float32)
    q2_ref = critic_reference(state2, action2, params)
    q2 = jax.block_until_ready(
        critic_forward(state2, action2, params, tile_b=128,
                       compute_dtype=jnp.float32))
    assert q2.shape == (big_b, 1), q2.shape
    assert jnp.allclose(q2, q2_ref, atol=1e-4, rtol=1e-4)

    # 3) Auto compute dtype (bf16 MXU operands on v6e/v7x, f32 elsewhere);
    #    f32 accumulation, so only input/weight rounding differs.
    q3 = jax.block_until_ready(critic_forward(state, action, params))
    assert jnp.allclose(q3, q_ref, atol=1e-1, rtol=1e-1)

    print("KERNEL_OK")
</pallas_src>

<mosaic_0001>
module attributes {stable_mosaic.version = 11 : i64} {
  func.func @critic_kernel(%arg0: i32, %arg1: memref<6x64xf32, #tpu.memory_space<vmem>>, %arg2: memref<2x64xf32, #tpu.memory_space<vmem>>, %arg3: memref<32x8xf32, #tpu.memory_space<vmem>>, %arg4: memref<32x1xf32, #tpu.memory_space<vmem>>, %arg5: memref<32x32xf32, #tpu.memory_space<vmem>>, %arg6: memref<32x1xf32, #tpu.memory_space<vmem>>, %arg7: memref<1x32xf32, #tpu.memory_space<vmem>>, %arg8: memref<1x1xf32, #tpu.memory_space<smem>>, %arg9: memref<1x64xf32, #tpu.memory_space<vmem>>, %arg10: memref<8x64xf32, #tpu.memory_space<vmem>>) attributes {dimension_semantics = [#tpu.dimension_semantics<parallel>], iteration_bounds = array<i64: 1>, scalar_prefetch = 0 : i64, scratch_operands = 1 : i64, tpu.core_type = #tpu.core_type<tc>, window_params = [{transform_indices = @transform_0, window_bounds = array<i64: 6, 64>}, {transform_indices = @transform_1, window_bounds = array<i64: 2, 64>}, {pipeline_mode = #tpu.pipeline_mode<synchronous>, transform_indices = @transform_2, window_bounds = array<i64: 32, 8>}, {pipeline_mode = #tpu.pipeline_mode<synchronous>, transform_indices = @transform_3, window_bounds = array<i64: 32, 1>}, {pipeline_mode = #tpu.pipeline_mode<synchronous>, transform_indices = @transform_4, window_bounds = array<i64: 32, 32>}, {pipeline_mode = #tpu.pipeline_mode<synchronous>, transform_indices = @transform_5, window_bounds = array<i64: 32, 1>}, {pipeline_mode = #tpu.pipeline_mode<synchronous>, transform_indices = @transform_6, window_bounds = array<i64: 1, 32>}, {transform_indices = @transform_7, window_bounds = array<i64: 1, 1>}, {transform_indices = @transform_8, window_bounds = array<i64: 1, 64>}]} {
    %c0 = arith.constant 0 : index
    %c0_0 = arith.constant 0 : index
    %0 = vector.load %arg1[%c0, %c0_0] : memref<6x64xf32, #tpu.memory_space<vmem>>, vector<6x64xf32>
    %c0_1 = arith.constant 0 : index
    %c0_2 = arith.constant 0 : index
    %1 = vector.load %arg10[%c0_1, %c0_2] : memref<8x64xf32, #tpu.memory_space<vmem>>, vector<6x64xf32>
    tpu.vector_store %arg10[%c0_1, %c0_2], %0 {strides = array<i32>} : memref<8x64xf32, #tpu.memory_space<vmem>>, vector<6x64xf32>,
    %c0_3 = arith.constant 0 : index
    %c0_4 = arith.constant 0 : index
    %2 = vector.load %arg2[%c0_3, %c0_4] : memref<2x64xf32, #tpu.memory_space<vmem>>, vector<2x64xf32>
    %c6 = arith.constant 6 : index
    %c0_5 = arith.constant 0 : index
    %3 = vector.load %arg10[%c6, %c0_5] : memref<8x64xf32, #tpu.memory_space<vmem>>, vector<2x64xf32>
    tpu.vector_store %arg10[%c6, %c0_5], %2 {strides = array<i32>} : memref<8x64xf32, #tpu.memory_space<vmem>>, vector<2x64xf32>,
    %c0_6 = arith.constant 0 : index
    %c0_7 = arith.constant 0 : index
    %4 = vector.load %arg3[%c0_6, %c0_7] : memref<32x8xf32, #tpu.memory_space<vmem>>, vector<32x8xf32>
    %c0_8 = arith.constant 0 : index
    %c0_9 = arith.constant 0 : index
    %5 = vector.load %arg10[%c0_8, %c0_9] : memref<8x64xf32, #tpu.memory_space<vmem>>, vector<8x64xf32>
    %cst = arith.constant dense<0.000000e+00> : vector<32x64xf32>
    %6 = tpu.matmul %4, %5, %cst {dimension_numbers = #tpu.dot_dimension_numbers<[1], [0], [0], [1], [0, 0, 1, 1], [], []>} : vector<32x8xf32>, vector<8x64xf32>, vector<32x64xf32> -> vector<32x64xf32>
    %c0_10 = arith.constant 0 : index
    %c0_11 = arith.constant 0 : index
    %7 = vector.load %arg4[%c0_10, %c0_11] : memref<32x1xf32, #tpu.memory_space<vmem>>, vector<32x1xf32>
    %8 = vector.broadcast %7 : vector<32x1xf32> to vector<32x64xf32>
    %9 = arith.addf %6, %8 : vector<32x64xf32>
    %cst_12 = arith.constant 0.000000e+00 : f32
    %10 = vector.broadcast %cst_12 : f32 to vector<32x64xf32>
    %11 = arith.maximumf %9, %10 : vector<32x64xf32>
    %c0_13 = arith.constant 0 : index
    %c0_14 = arith.constant 0 : index
    %12 = vector.load %arg5[%c0_13, %c0_14] : memref<32x32xf32, #tpu.memory_space<vmem>>, vector<32x32xf32>
    %cst_15 = arith.constant dense<0.000000e+00> : vector<32x64xf32>
    %13 = tpu.matmul %12, %11, %cst_15 {dimension_numbers = #tpu.dot_dimension_numbers<[1], [0], [0], [1], [0, 0, 1, 1], [], []>} : vector<32x32xf32>, vector<32x64xf32>, vector<32x64xf32> -> vector<32x64xf32>
    %c0_16 = arith.constant 0 : index
    %c0_17 = arith.constant 0 : index
    %14 = vector.load %arg6[%c0_16, %c0_17] : memref<32x1xf32, #tpu.memory_space<vmem>>, vector<32x1xf32>
    %15 = vector.broadcast %14 : vector<32x1xf32> to vector<32x64xf32>
    %16 = arith.addf %13, %15 : vector<32x64xf32>
    %cst_18 = arith.constant 0.000000e+00 : f32
    %17 = vector.broadcast %cst_18 : f32 to vector<32x64xf32>
    %18 = arith.maximumf %16, %17 : vector<32x64xf32>
    %c0_19 = arith.constant 0 : index
    %c0_20 = arith.constant 0 : index
    %19 = vector.load %arg7[%c0_19, %c0_20] : memref<1x32xf32, #tpu.memory_space<vmem>>, vector<1x32xf32>
    %cst_21 = arith.constant dense<0.000000e+00> : vector<1x64xf32>
    %20 = tpu.matmul %19, %18, %cst_21 {dimension_numbers = #tpu.dot_dimension_numbers<[1], [0], [0], [1], [0, 0, 1, 1], [], []>} : vector<1x32xf32>, vector<32x64xf32>, vector<1x64xf32> -> vector<1x64xf32>
    %c0_22 = arith.constant 0 : index
    %c0_23 = arith.constant 0 : index
    %21 = memref.load %arg8[%c0_22, %c0_23] : memref<1x1xf32, #tpu.memory_space<smem>>
    %22 = vector.broadcast %21 : f32 to vector<1x64xf32>
    %23 = arith.addf %20, %22 : vector<1x64xf32>
    %c0_24 = arith.constant 0 : index
    %c0_25 = arith.constant 0 : index
    %24 = vector.load %arg9[%c0_24, %c0_25] : memref<1x64xf32, #tpu.memory_space<vmem>>, vector<1x64xf32>
    tpu.vector_store %arg9[%c0_24, %c0_25], %23 {strides = array<i32>} : memref<1x64xf32, #tpu.memory_space<vmem>>, vector<1x64xf32>,
    return
  }
  func.func @transform_0(%arg0: i32) -> (i32, i32) {
    %c0_i32 = arith.constant 0 : i32
    %c0_i32_0 = arith.constant 0 : i32
    return %c0_i32, %arg0 : i32, i32
  }
  func.func @transform_1(%arg0: i32) -> (i32, i32) {
    %c0_i32 = arith.constant 0 : i32
    %c0_i32_0 = arith.constant 0 : i32
    return %c0_i32, %arg0 : i32, i32
  }
  func.func @transform_2(%arg0: i32) -> (i32, i32) {
    %c0_i32 = arith.constant 0 : i32
    %c0_i32_0 = arith.constant 0 : i32
    %c0_i32_1 = arith.constant 0 : i32
    return %c0_i32, %c0_i32_0 : i32, i32
  }
  func.func @transform_3(%arg0: i32) -> (i32, i32) {
    %c0_i32 = arith.constant 0 : i32
    %c0_i32_0 = arith.constant 0 : i32
    %c0_i32_1 = arith.constant 0 : i32
    return %c0_i32, %c0_i32_0 : i32, i32
  }
  func.func @transform_4(%arg0: i32) -> (i32, i32) {
    %c0_i32 = arith.constant 0 : i32
    %c0_i32_0 = arith.constant 0 : i32
    %c0_i32_1 = arith.constant 0 : i32
    return %c0_i32, %c0_i32_0 : i32, i32
  }
  func.func @transform_5(%arg0: i32) -> (i32, i32) {
    %c0_i32 = arith.constant 0 : i32
    %c0_i32_0 = arith.constant 0 : i32
    %c0_i32_1 = arith.constant 0 : i32
    return %c0_i32, %c0_i32_0 : i32, i32
  }
  func.func @transform_6(%arg0: i32) -> (i32, i32) {
    %c0_i32 = arith.constant 0 : i32
    %c0_i32_0 = arith.constant 0 : i32
    %c0_i32_1 = arith.constant 0 : i32
    return %c0_i32, %c0_i32_0 : i32, i32
  }
  func.func @transform_7(%arg0: i32) -> (i32, i32) {
    %c0_i32 = arith.constant 0 : i32
    %c0_i32_0 = arith.constant 0 : i32
    %c0_i32_1 = arith.constant 0 : i32
    return %c0_i32, %c0_i32_0 : i32, i32
  }
  func.func @transform_8(%arg0: i32) -> (i32, i32) {
    %c0_i32 = arith.constant 0 : i32
    %c0_i32_0 = arith.constant 0 : i32
    return %c0_i32, %arg0 : i32, i32
  }
}

</mosaic_0001>

<bundles_post_ra>
// kernel: critic_forward.1
= control target key start
LH: loop header
LB: loop body
LE: loop exit
PB: predicated region body
PF: predicated region fallthrough
CT: control target
= control target key end

     0   :  { %vm32_vm0 = vcmask 521216   ;;  %vm35_vm1 = vcmask 517120   ;;  %v275_v2 = vmov 0   ;;  %s394_s0 = inlined_call_operand.vmem [shape: f32[6,64], index: 0, kind: input, shape index: {}]   ;;  %s395_s1 = inlined_call_operand.vmem [shape: f32[2,64], index: 1, kind: input, shape index: {}]   ;;  %s396_s2 = inlined_call_operand.vmem [shape: f32[32,8], index: 2, kind: input, shape index: {}]   ;;  %s397_s3 = inlined_call_operand.vmem [shape: f32[32,1], index: 3, kind: input, shape index: {}]   ;;  %s398_s4 = inlined_call_operand.vmem [shape: f32[32,32], index: 4, kind: input, shape index: {}]   ;;  %s399_s5 = inlined_call_operand.vmem [shape: f32[32,1], index: 5, kind: input, shape index: {}]   ;;  %s400_s6 = inlined_call_operand.vmem [shape: f32[1,32], index: 6, kind: input, shape index: {}]   ;;  %s401_s7 = inlined_call_operand.<no memory space> [shape: f32[1,1], index: 7, kind: input, shape index: {}]   ;;  %s402_s8 = inlined_call_operand.hbm [shape: f32[1,64], index: 8, kind: output, shape index: {}]  }
   0x1   :  { %v31_v0 = vld [vmem:[%s394_s0] sm:$0x3f]  ;;  %247 = vset.pattern.permute.xlu1 %v275_v2  ;;  %246 = vset.pattern.permute.xlu0 %v275_v2  ;;  %v45_v3 = vld [vmem:[%s397_s3 + $0x18] sm:$0xff]  ;;  %v43_v4 = vld [vmem:[%s397_s3 + $0x8] sm:$0xff] }
   0x2   :  { %v34_v1 = vld [vmem:[%s395_s1] sm:$0x3]  ;;  %33 = vst.msk [vmem:[#allocation2] sm:$0x3f] %vm32_vm0, %v31_v0  ;;  %63 = vperm.xlu0 %246, %v45_v3   ;;  %53 = vperm.xlu1 %247, %v43_v4  }
   0x3   :  { %36 = vst.msk [vmem:[#allocation2 + $0x6] sm:$0x3] %vm35_vm1, %v34_v1  ;;  %248 = vset.pattern.permute.xlu2 %v275_v2 }
   0x4   :  { %14 = vsyncpa [#allocation5], 0  ;;  %v37_v5 = vld [vmem:[%s396_s2] sm:$0xff]  ;;  %vm66_vm2 = vcmask 64512   ;;  %v40_v6 = vld [vmem:[%s396_s2 + $0x18] sm:$0xff]  ;;  %vm140_vm3 = vcmask 261120   ;;  %v188_v53 = vstv %s401_s7 }
   0x5   :  { %v44_v8 = vld [vmem:[%s397_s3 + $0x10] sm:$0xff]  ;;  %v42_v9 = vld [vmem:[%s397_s3] sm:$0xff]  ;;  %v38_v10 = vld [vmem:[%s396_s2 + $0x8] sm:$0xff]  ;;  %s276_s15 = smov [#allocation4]   ;;  %s221_s19 = sshll.u32 %s402_s8, 4  ;;  %vm212_vm4 = vcmask 516096   ;;  %s222_s19 = int_to_ptr.hbm [resolvable:$true] %s221_s19 }
   0x6   :  { %v117_v11 = vld [vmem:[%s399_s5 + $0x8] sm:$0xff]  ;;  %v116_v12 = vld [vmem:[%s399_s5] sm:$0xff]  ;;  %v39_v13 = vld [vmem:[%s396_s2 + $0x10] sm:$0xff]  ;;  %s219_s16 = sshll.u32 %s276_s15, 4  ;;  %s220_s16 = int_to_ptr.vmem [resolvable:$true] %s219_s16 }
   0x7   :  { %v119_v15 = vld [vmem:[%s399_s5 + $0x18] sm:$0xff]  ;;  %v118_v22 = vld [vmem:[%s399_s5 + $0x10] sm:$0xff]  ;;  %v112_v32 = vld [vmem:[%s398_s4] sm:$0xff] }
   0x8   :  { %137 = vperm.xlu2 %248, %v119_v15   ;;  %v114_v33 = vld [vmem:[%s398_s4 + $0x10] sm:$0xff]  ;;  %v113_v34 = vld [vmem:[%s398_s4 + $0x8] sm:$0xff]  ;;  %v115_v35 = vld [vmem:[%s398_s4 + $0x18] sm:$0xff] }
   0x9   :  { %v186_v52 = vld [vmem:[%s400_s6] sm:$0x1] }
   0xa   :  { %v41_v7 = vld [vmem:[#allocation2] sm:$0xff]  ;;  %58 = vperm.xlu0 %246, %v44_v8   ;;  %48 = vperm.xlu1 %247, %v42_v9  }
   0xb   :  { %94 = vmatpush.msra.mxu0 %v41_v7  ;;  %239 = vmatpush.msra.mxu2 %v41_v7 }
   0xc   :  { %230 = vmatmul.msk.f32.vlgmr.msra.gmra.mxu0 %vm66_vm2, %v37_v5  ;;  %233 = vmatmul.msk.f32.vlgmr.msra.gmra.mxu2 %vm66_vm2, %v40_v6 }
  0x10   :  { %132 = vperm.xlu2 %248, %v118_v22  }
  0x12   :  { %127 = vperm.xlu0 %246, %v117_v11   ;;  %122 = vperm.xlu1 %247, %v116_v12  }
  0x14   :  { %231 = vmatmul.msk.f32.gmra.mxu0 %vm66_vm2, %v38_v10 }
  0x1c   :  { %232 = vmatmul.msk.f32.gmra.mxu0 %vm66_vm2, %v39_v13 }
  0x62   :  { %v138_v36 = vpop.permute.xlu2 %137 }
  0x6a   :  { %v133_v39 = vpop.permute.xlu2 %132 }
  0x74   :  { %v64_v16 = vpop.permute.xlu0 %63  ;;  %v54_v17 = vpop.permute.xlu1 %53 }
  0x7c   :  { %v59_v23 = vpop.permute.xlu0 %58  ;;  %v49_v24 = vpop.permute.xlu1 %48 }
  0x84   :  { %v128_v44 = vpop.permute.xlu0 %127  ;;  %v123_v47 = vpop.permute.xlu1 %122 }
  0x89   :  { %v96_v14 = vpop.f32.mrf.mxu0 }
  0x8a   :  { %v97_v28 = vadd.f32 %v96_v14, %v49_v24 }
  0x8c   :  { %v108_v31 = vmax.f32 %v97_v28, 0.0 }
  0x8f   :  { %v105_v18 = vpop.f32.mrf.mxu2 }
  0x90   :  { %v106_v19 = vadd.f32 %v105_v18, %v64_v16 }
  0x91   :  { %v99_v20 = vpop.f32.mrf.mxu0 }
  0x92   :  { %v111_v21 = vmax.f32 %v106_v19, 0.0  ;;  %v100_v26 = vadd.f32 %v99_v20, %v54_v17 }
  0x94   :  { %165 = vmatpush.msra.mxu1 %v111_v21  ;;  %240 = vmatpush.msra.mxu3 %v111_v21  ;;  %v109_v30 = vmax.f32 %v100_v26, 0.0 }
  0x99   :  { %v102_v25 = vpop.f32.mrf.mxu0 }
  0x9a   :  { %v103_v27 = vadd.f32 %v102_v25, %v59_v23 }
  0x9c   :  { %v110_v29 = vmax.f32 %v103_v27, 0.0 }
  0x9e   :  { %166 = vmatpush.msra.mxu1 %v110_v29  ;;  %241 = vmatpush.msra.mxu3 %v110_v29 }
  0xa0   :  { %167 = vmatpush.msra.mxu1 %v109_v30  ;;  %242 = vmatpush.msra.mxu3 %v109_v30 }
  0xa2   :  { %168 = vmatpush.msra.mxu1 %v108_v31  ;;  %243 = vmatpush.msra.mxu3 %v108_v31 }
  0xa3   :  { %234 = vmatmul.msk.f32.vlgmr.msra.gmra.mxu1 %vm140_vm3, %v112_v32  ;;  %236 = vmatmul.msk.f32.vlgmr.msra.gmra.mxu3 %vm140_vm3, %v114_v33 }
  0xab   :  { %235 = vmatmul.msk.f32.gmra.mxu1 %vm140_vm3, %v113_v34  ;;  %237 = vmatmul.msk.f32.gmra.mxu3 %vm140_vm3, %v115_v35 }
 0x120   :  { %v170_v37 = vpop.f32.mrf.mxu1 }
 0x121   :  { %v171_v48 = vadd.f32 %v170_v37, %v123_v47 }
 0x123   :  { %v182_v51 = vmax.f32 %v171_v48, 0.0 }
 0x126   :  { %v176_v38 = vpop.f32.mrf.mxu3 }
 0x127   :  { %v177_v42 = vadd.f32 %v176_v38, %v133_v39 }
 0x128   :  { %v173_v40 = vpop.f32.mrf.mxu1 }
 0x129   :  { %v174_v45 = vadd.f32 %v173_v40, %v128_v44  ;;  %v184_v49 = vmax.f32 %v177_v42, 0.0 }
 0x12b   :  { %v183_v50 = vmax.f32 %v174_v45, 0.0 }
 0x12e   :  { %v179_v41 = vpop.f32.mrf.mxu3 }
 0x12f   :  { %v180_v43 = vadd.f32 %v179_v41, %v138_v36 }
 0x131   :  { %v185_v46 = vmax.f32 %v180_v43, 0.0 }
 0x133   :  { %204 = vmatpush.msrb.mxu2 %v185_v46 }
 0x135   :  { %205 = vmatpush.msrb.mxu2 %v184_v49 }
 0x137   :  { %206 = vmatpush.msrb.mxu2 %v183_v50 }
 0x139   :  { %207 = vmatpush.msrb.mxu2 %v182_v51 }
 0x13a   :  { %238 = vmatmul.msk.f32.vlgmr.msrb.gmra.mxu2 %vm140_vm3, %v186_v52 }
 0x1bd   :  { %v209_v54 = vpop.f32.mrf.mxu2 }
 0x1be   :  { %v210_v55 = vadd.f32 %v209_v54, %v188_v53 }
 0x1c0   :  { %213 = vst.msk [vmem:[#allocation4] sm:$0x1] %vm212_vm4, %v210_v55 }
 0x1c1   :  { %224 = dma.vmem_to_hbm [thread:$0]  %s220_s16, 16, %s222_s19, [#allocation5]  }
 0x1c2   :  { %273 = dma.done.wait [#allocation5], 16  }
 0x1c3   :  { %274 = vsyncadd [#allocation5], 4294967280 }
 0x1c4   :  { %229 = vsyncpa [#allocation5], 1 }

</bundles_post_ra>
